<compile_context>
chip_gen: v5e
topology: v5e:2x2
jax: 0.10.0
libtpu: 0.0.40
codegen_flags: <defaults>
</compile_context>

<pallas_src>
import functools

import jax
import jax.numpy as jnp
from jax import lax
from jax.experimental import pallas as pl
from jax.experimental.pallas import tpu as pltpu

NEG_SLOPE = 0.01      # torch.nn.LeakyReLU default
LANES = 128           # lane width / padded feature dim
PAD_IN = 8            # padded input-feature dim (real = 2)
IN_DIM = 2
HID = 100


def _leaky_relu(v):
    return jnp.where(v >= 0, v, NEG_SLOPE * v)


def _round_up(n, m):
    return (n + m - 1) // m * m


# --------------------------------------------------------------------------
# Kernel
# --------------------------------------------------------------------------
def simple_gan_kernel(x_ref, gw1_ref, gw2_ref, gw3_ref, dw1_ref, dw2_ref,
                      bias_ref, out_ref, *, use_bf16):
    x = x_ref[...]                       # [TB, 8]  (cols 0-1 real)
    bw = bias_ref[...]                   # [8, 128] packed bias / dw3 slab
    gb1, gb2, gb3 = bw[0:1, :], bw[1:2, :], bw[2:3, :]
    db1, db2, db3 = bw[3:4, :], bw[4:5, :], bw[5:6, :]
    w3d = bw[6:7, :]                     # discriminator final-layer weights (row)

    mm_dtype = jnp.bfloat16 if use_bf16 else jnp.float32

    def mm(a, w_ref):
        return jnp.dot(a.astype(mm_dtype), w_ref[...].astype(mm_dtype),
                       preferred_element_type=jnp.float32)

    # ---- Generator: Linear(2,100) -> LeakyReLU -> Linear(100,100) -> LeakyReLU -> Linear(100,2)
    # First layer on the VPU: two broadcast FMAs instead of a K=2 MXU matmul.
    h = _leaky_relu(x[:, 0:1] * gw1_ref[0:1, :] + x[:, 1:2] * gw1_ref[1:2, :] + gb1)
    h = _leaky_relu(mm(h, gw2_ref) + gb2)
    g = mm(h, gw3_ref) + gb3             # [TB, 128]; cols 0-1 real, rest exactly 0

    # ---- Discriminator: Linear(2,100) -> LeakyReLU -> Linear(100,100) -> LeakyReLU -> Linear(100,1) -> Sigmoid
    d = _leaky_relu(g[:, 0:1] * dw1_ref[0:1, :] + g[:, 1:2] * dw1_ref[1:2, :] + db1)
    d = _leaky_relu(mm(d, dw2_ref) + db2)
    # 100 -> 1 as VPU multiply + lane reduction (avoids a 1-column MXU result).
    z = jnp.sum(d * w3d, axis=-1, keepdims=True) + db3[:, 0:1]     # [TB, 1]
    prob = pl.reciprocal(1.0 + jnp.exp(-z), approx=True)           # sigmoid on EUP

    # Single lane-dense output slab: gen in cols 0-1, disc prob in col 2.
    col = lax.broadcasted_iota(jnp.int32, (1, LANES), 1)
    out_ref[...] = jnp.where(col == 2, prob, g)


# --------------------------------------------------------------------------
# Wrapper
# --------------------------------------------------------------------------
def simple_gan_forward(x, packed_params, *, block_rows=512, use_bf16=False):
    """x: [N, 2] float32.  Returns (gen [N,2], disc_prob [N,1])."""
    gw1p, gw2p, gw3p, dw1p, dw2p, bias_slab = packed_params
    n = x.shape[0]

    # Batch tile: whole (8-padded) batch if small, otherwise block_rows.
    tb = min(block_rows, _round_up(max(n, 8), 8))
    n_pad = _round_up(n, tb)
    x_pad = jnp.zeros((n_pad, PAD_IN), jnp.float32).at[:n, :IN_DIM].set(
        x.astype(jnp.float32))

    grid = (n_pad // tb,)
    kernel = functools.partial(simple_gan_kernel, use_bf16=use_bf16)

    out = pl.pallas_call(
        kernel,
        out_shape=jax.ShapeDtypeStruct((n_pad, LANES), jnp.float32),
        grid_spec=pltpu.PrefetchScalarGridSpec(
            num_scalar_prefetch=0,
            grid=grid,
            in_specs=[
                pl.BlockSpec((tb, PAD_IN), lambda i: (i, 0)),       # x tile
                pl.BlockSpec((PAD_IN, LANES), lambda i: (0, 0)),    # gw1 (resident)
                pl.BlockSpec((LANES, LANES), lambda i: (0, 0)),     # gw2
                pl.BlockSpec((LANES, LANES), lambda i: (0, 0)),     # gw3
                pl.BlockSpec((PAD_IN, LANES), lambda i: (0, 0)),    # dw1
                pl.BlockSpec((LANES, LANES), lambda i: (0, 0)),     # dw2
                pl.BlockSpec((8, LANES), lambda i: (0, 0)),         # bias slab
            ],
            out_specs=pl.BlockSpec((tb, LANES), lambda i: (i, 0)),
        ),
        compiler_params=pltpu.CompilerParams(
            dimension_semantics=("parallel",),        # shards batch across TCs on v7x
            vmem_limit_bytes=16 * 1024 * 1024,        # honest budget (v7x: 64 MiB phys)
        ),
    )(x_pad, gw1p, gw2p, gw3p, dw1p, dw2p, bias_slab)

    gen = out[:n, :IN_DIM]
    disc = out[:n, 2:3]
    return gen, disc


# --------------------------------------------------------------------------
# Params
# --------------------------------------------------------------------------
def init_params(key):
    """PyTorch-shaped (but [in,out]) weights; biases 1-D."""
    def linear(key, fan_in, fan_out):
        kw, kb = jax.random.split(key)
        bound = 1.0 / jnp.sqrt(fan_in)
        w = jax.random.uniform(kw, (fan_in, fan_out), jnp.float32, -bound, bound)
        b = jax.random.uniform(kb, (fan_out,), jnp.float32, -bound, bound)
        return w, b

    keys = jax.random.split(key, 6)
    gw1, gb1 = linear(keys[0], IN_DIM, HID)
    gw2, gb2 = linear(keys[1], HID, HID)
    gw3, gb3 = linear(keys[2], HID, IN_DIM)
    dw1, db1 = linear(keys[3], IN_DIM, HID)
    dw2, db2 = linear(keys[4], HID, HID)
    dw3, db3 = linear(keys[5], HID, 1)
    return (gw1, gb1, gw2, gb2, gw3, gb3, dw1, db1, dw2, db2, dw3, db3)


def pack_params(params):
    """Zero-pad everything to (8,128)-aligned tiles; fuse biases + dw3 into one slab."""
    (gw1, gb1, gw2, gb2, gw3, gb3, dw1, db1, dw2, db2, dw3, db3) = params

    def pad2(w, r, c):
        return jnp.zeros((r, c), jnp.float32).at[:w.shape[0], :w.shape[1]].set(w)

    def pad_row(v):
        return jnp.zeros((LANES,), jnp.float32).at[:v.shape[0]].set(v)

    gw1p = pad2(gw1, PAD_IN, LANES)
    gw2p = pad2(gw2, LANES, LANES)
    gw3p = pad2(gw3, LANES, LANES)
    dw1p = pad2(dw1, PAD_IN, LANES)
    dw2p = pad2(dw2, LANES, LANES)
    bias_slab = jnp.stack(
        [pad_row(gb1), pad_row(gb2), pad_row(gb3),
         pad_row(db1), pad_row(db2), pad_row(db3),
         pad_row(dw3[:, 0]),                       # disc final weights as a row
         jnp.zeros((LANES,), jnp.float32)],
        axis=0)                                    # [8, 128]
    return (gw1p, gw2p, gw3p, dw1p, dw2p, bias_slab)


# --------------------------------------------------------------------------
# Plain-JAX reference
# --------------------------------------------------------------------------
def reference_forward(x, params):
    (gw1, gb1, gw2, gb2, gw3, gb3, dw1, db1, dw2, db2, dw3, db3) = params
    P = lax.Precision.HIGHEST
    h = _leaky_relu(jnp.dot(x, gw1, precision=P) + gb1)
    h = _leaky_relu(jnp.dot(h, gw2, precision=P) + gb2)
    g = jnp.dot(h, gw3, precision=P) + gb3
    d = _leaky_relu(jnp.dot(g, dw1, precision=P) + db1)
    d = _leaky_relu(jnp.dot(d, dw2, precision=P) + db2)
    d = jax.nn.sigmoid(jnp.dot(d, dw3, precision=P) + db3)
    return g, d


if __name__ == "__main__":
    key = jax.random.PRNGKey(0)
    k_param, k_x1, k_x2 = jax.random.split(key, 3)

    params = init_params(k_param)
    packed = pack_params(params)

    # Small batch (single grid step), f32 MXU path.
    x_small = jax.random.normal(k_x1, (8, IN_DIM), jnp.float32)
    gen, disc = simple_gan_forward(x_small, packed)
    jax.block_until_ready((gen, disc))
    g_ref, d_ref = reference_forward(x_small, params)
    assert gen.shape == (8, 2) and disc.shape == (8, 1)
    assert jnp.allclose(gen, g_ref, atol=1e-3, rtol=1e-3)
    assert jnp.allclose(disc, d_ref, atol=5e-3, rtol=5e-3)

    # Ragged larger batch exercising the batch grid (300 rows -> 3 steps of 128).
    x_big = jax.random.normal(k_x2, (300, IN_DIM), jnp.float32)
    gen_b, disc_b = simple_gan_forward(x_big, packed, block_rows=128)
    jax.block_until_ready((gen_b, disc_b))
    gb_ref, db_ref = reference_forward(x_big, params)
    assert jnp.allclose(gen_b, gb_ref, atol=1e-3, rtol=1e-3)
    assert jnp.allclose(disc_b, db_ref, atol=5e-3, rtol=5e-3)

    # bf16-MXU-operand path (v6e/v7x), f32 accumulation; loose tolerance.
    gen16, disc16 = simple_gan_forward(x_big, packed, block_rows=128, use_bf16=True)
    jax.block_until_ready((gen16, disc16))
    assert jnp.allclose(gen16, gb_ref, atol=1e-1, rtol=1e-1)
    assert jnp.allclose(disc16, db_ref, atol=5e-2, rtol=5e-2)

    print("KERNEL_OK")
</pallas_src>

<mosaic_0001>
module attributes {stable_mosaic.version = 11 : i64} {
  func.func @simple_gan_kernel(%arg0: i32, %arg1: memref<8x8xf32, #tpu.memory_space<vmem>>, %arg2: memref<8x128xf32, #tpu.memory_space<vmem>>, %arg3: memref<128x128xf32, #tpu.memory_space<vmem>>, %arg4: memref<128x128xf32, #tpu.memory_space<vmem>>, %arg5: memref<8x128xf32, #tpu.memory_space<vmem>>, %arg6: memref<128x128xf32, #tpu.memory_space<vmem>>, %arg7: memref<8x128xf32, #tpu.memory_space<vmem>>, %arg8: memref<8x128xf32, #tpu.memory_space<vmem>>) attributes {dimension_semantics = [#tpu.dimension_semantics<parallel>], iteration_bounds = array<i64: 1>, scalar_prefetch = 0 : i64, scratch_operands = 0 : i64, tpu.core_type = #tpu.core_type<tc>, window_params = [{transform_indices = @transform_0, window_bounds = array<i64: 8, 8>}, {pipeline_mode = #tpu.pipeline_mode<synchronous>, transform_indices = @transform_1, window_bounds = array<i64: 8, 128>}, {pipeline_mode = #tpu.pipeline_mode<synchronous>, transform_indices = @transform_2, window_bounds = array<i64: 128, 128>}, {pipeline_mode = #tpu.pipeline_mode<synchronous>, transform_indices = @transform_3, window_bounds = array<i64: 128, 128>}, {pipeline_mode = #tpu.pipeline_mode<synchronous>, transform_indices = @transform_4, window_bounds = array<i64: 8, 128>}, {pipeline_mode = #tpu.pipeline_mode<synchronous>, transform_indices = @transform_5, window_bounds = array<i64: 128, 128>}, {pipeline_mode = #tpu.pipeline_mode<synchronous>, transform_indices = @transform_6, window_bounds = array<i64: 8, 128>}, {transform_indices = @transform_7, window_bounds = array<i64: 8, 128>}]} {
    %c0 = arith.constant 0 : index
    %c0_0 = arith.constant 0 : index
    %0 = vector.load %arg1[%c0, %c0_0] : memref<8x8xf32, #tpu.memory_space<vmem>>, vector<8x8xf32>
    %c0_1 = arith.constant 0 : index
    %c0_2 = arith.constant 0 : index
    %1 = vector.load %arg7[%c0_1, %c0_2] : memref<8x128xf32, #tpu.memory_space<vmem>>, vector<8x128xf32>
    %2 = vector.extract_strided_slice %1 {offsets = [0, 0], sizes = [1, 128], strides = [1, 1]} : vector<8x128xf32> to vector<1x128xf32>
    %3 = vector.extract_strided_slice %1 {offsets = [1, 0], sizes = [1, 128], strides = [1, 1]} : vector<8x128xf32> to vector<1x128xf32>
    %4 = vector.extract_strided_slice %1 {offsets = [2, 0], sizes = [1, 128], strides = [1, 1]} : vector<8x128xf32> to vector<1x128xf32>
    %5 = vector.extract_strided_slice %1 {offsets = [3, 0], sizes = [1, 128], strides = [1, 1]} : vector<8x128xf32> to vector<1x128xf32>
    %6 = vector.extract_strided_slice %1 {offsets = [4, 0], sizes = [1, 128], strides = [1, 1]} : vector<8x128xf32> to vector<1x128xf32>
    %7 = vector.extract_strided_slice %1 {offsets = [5, 0], sizes = [1, 128], strides = [1, 1]} : vector<8x128xf32> to vector<1x128xf32>
    %8 = vector.extract_strided_slice %1 {offsets = [6, 0], sizes = [1, 128], strides = [1, 1]} : vector<8x128xf32> to vector<1x128xf32>
    %9 = vector.extract_strided_slice %0 {offsets = [0, 0], sizes = [8, 1], strides = [1, 1]} : vector<8x8xf32> to vector<8x1xf32>
    %c0_3 = arith.constant 0 : index
    %c0_4 = arith.constant 0 : index
    %10 = vector.load %arg2[%c0_3, %c0_4] : memref<8x128xf32, #tpu.memory_space<vmem>>, vector<1x128xf32>
    %11 = vector.broadcast %9 : vector<8x1xf32> to vector<8x128xf32>
    %12 = vector.broadcast %10 : vector<1x128xf32> to vector<8x128xf32>
    %13 = arith.mulf %11, %12 : vector<8x128xf32>
    %14 = vector.extract_strided_slice %0 {offsets = [0, 1], sizes = [8, 1], strides = [1, 1]} : vector<8x8xf32> to vector<8x1xf32>
    %c1 = arith.constant 1 : index
    %c0_5 = arith.constant 0 : index
    %15 = vector.load %arg2[%c1, %c0_5] : memref<8x128xf32, #tpu.memory_space<vmem>>, vector<1x128xf32>
    %16 = vector.broadcast %14 : vector<8x1xf32> to vector<8x128xf32>
    %17 = vector.broadcast %15 : vector<1x128xf32> to vector<8x128xf32>
    %18 = arith.mulf %16, %17 : vector<8x128xf32>
    %19 = arith.addf %13, %18 : vector<8x128xf32>
    %20 = vector.broadcast %2 : vector<1x128xf32> to vector<8x128xf32>
    %21 = arith.addf %19, %20 : vector<8x128xf32>
    %cst = arith.constant 0.000000e+00 : f32
    %22 = vector.broadcast %cst : f32 to vector<8x128xf32>
    %23 = arith.cmpf oge, %21, %22 : vector<8x128xf32>
    %cst_6 = arith.constant 0.00999999977 : f32
    %24 = vector.broadcast %cst_6 : f32 to vector<8x128xf32>
    %25 = arith.mulf %24, %21 : vector<8x128xf32>
    %26 = arith.select %23, %21, %25 : vector<8x128xi1>, vector<8x128xf32>
    %c0_7 = arith.constant 0 : index
    %c0_8 = arith.constant 0 : index
    %27 = vector.load %arg3[%c0_7, %c0_8] : memref<128x128xf32, #tpu.memory_space<vmem>>, vector<128x128xf32>
    %cst_9 = arith.constant dense<0.000000e+00> : vector<8x128xf32>
    %28 = tpu.matmul %26, %27, %cst_9 {dimension_numbers = #tpu.dot_dimension_numbers<[1], [0], [0], [1], [0, 0, 1, 1], [], []>} : vector<8x128xf32>, vector<128x128xf32>, vector<8x128xf32> -> vector<8x128xf32>
    %29 = vector.broadcast %3 : vector<1x128xf32> to vector<8x128xf32>
    %30 = arith.addf %28, %29 : vector<8x128xf32>
    %cst_10 = arith.constant 0.000000e+00 : f32
    %31 = vector.broadcast %cst_10 : f32 to vector<8x128xf32>
    %32 = arith.cmpf oge, %30, %31 : vector<8x128xf32>
    %cst_11 = arith.constant 0.00999999977 : f32
    %33 = vector.broadcast %cst_11 : f32 to vector<8x128xf32>
    %34 = arith.mulf %33, %30 : vector<8x128xf32>
    %35 = arith.select %32, %30, %34 : vector<8x128xi1>, vector<8x128xf32>
    %c0_12 = arith.constant 0 : index
    %c0_13 = arith.constant 0 : index
    %36 = vector.load %arg4[%c0_12, %c0_13] : memref<128x128xf32, #tpu.memory_space<vmem>>, vector<128x128xf32>
    %cst_14 = arith.constant dense<0.000000e+00> : vector<8x128xf32>
    %37 = tpu.matmul %35, %36, %cst_14 {dimension_numbers = #tpu.dot_dimension_numbers<[1], [0], [0], [1], [0, 0, 1, 1], [], []>} : vector<8x128xf32>, vector<128x128xf32>, vector<8x128xf32> -> vector<8x128xf32>
    %38 = vector.broadcast %4 : vector<1x128xf32> to vector<8x128xf32>
    %39 = arith.addf %37, %38 : vector<8x128xf32>
    %40 = vector.extract_strided_slice %39 {offsets = [0, 0], sizes = [8, 1], strides = [1, 1]} : vector<8x128xf32> to vector<8x1xf32>
    %c0_15 = arith.constant 0 : index
    %c0_16 = arith.constant 0 : index
    %41 = vector.load %arg5[%c0_15, %c0_16] : memref<8x128xf32, #tpu.memory_space<vmem>>, vector<1x128xf32>
    %42 = vector.broadcast %40 : vector<8x1xf32> to vector<8x128xf32>
    %43 = vector.broadcast %41 : vector<1x128xf32> to vector<8x128xf32>
    %44 = arith.mulf %42, %43 : vector<8x128xf32>
    %45 = vector.extract_strided_slice %39 {offsets = [0, 1], sizes = [8, 1], strides = [1, 1]} : vector<8x128xf32> to vector<8x1xf32>
    %c1_17 = arith.constant 1 : index
    %c0_18 = arith.constant 0 : index
    %46 = vector.load %arg5[%c1_17, %c0_18] : memref<8x128xf32, #tpu.memory_space<vmem>>, vector<1x128xf32>
    %47 = vector.broadcast %45 : vector<8x1xf32> to vector<8x128xf32>
    %48 = vector.broadcast %46 : vector<1x128xf32> to vector<8x128xf32>
    %49 = arith.mulf %47, %48 : vector<8x128xf32>
    %50 = arith.addf %44, %49 : vector<8x128xf32>
    %51 = vector.broadcast %5 : vector<1x128xf32> to vector<8x128xf32>
    %52 = arith.addf %50, %51 : vector<8x128xf32>
    %cst_19 = arith.constant 0.000000e+00 : f32
    %53 = vector.broadcast %cst_19 : f32 to vector<8x128xf32>
    %54 = arith.cmpf oge, %52, %53 : vector<8x128xf32>
    %cst_20 = arith.constant 0.00999999977 : f32
    %55 = vector.broadcast %cst_20 : f32 to vector<8x128xf32>
    %56 = arith.mulf %55, %52 : vector<8x128xf32>
    %57 = arith.select %54, %52, %56 : vector<8x128xi1>, vector<8x128xf32>
    %c0_21 = arith.constant 0 : index
    %c0_22 = arith.constant 0 : index
    %58 = vector.load %arg6[%c0_21, %c0_22] : memref<128x128xf32, #tpu.memory_space<vmem>>, vector<128x128xf32>
    %cst_23 = arith.constant dense<0.000000e+00> : vector<8x128xf32>
    %59 = tpu.matmul %57, %58, %cst_23 {dimension_numbers = #tpu.dot_dimension_numbers<[1], [0], [0], [1], [0, 0, 1, 1], [], []>} : vector<8x128xf32>, vector<128x128xf32>, vector<8x128xf32> -> vector<8x128xf32>
    %60 = vector.broadcast %6 : vector<1x128xf32> to vector<8x128xf32>
    %61 = arith.addf %59, %60 : vector<8x128xf32>
    %cst_24 = arith.constant 0.000000e+00 : f32
    %62 = vector.broadcast %cst_24 : f32 to vector<8x128xf32>
    %63 = arith.cmpf oge, %61, %62 : vector<8x128xf32>
    %cst_25 = arith.constant 0.00999999977 : f32
    %64 = vector.broadcast %cst_25 : f32 to vector<8x128xf32>
    %65 = arith.mulf %64, %61 : vector<8x128xf32>
    %66 = arith.select %63, %61, %65 : vector<8x128xi1>, vector<8x128xf32>
    %67 = vector.broadcast %8 : vector<1x128xf32> to vector<8x128xf32>
    %68 = arith.mulf %66, %67 : vector<8x128xf32>
    %cst_26 = arith.constant dense<0.000000e+00> : vector<8xf32>
    %69 = vector.multi_reduction <add>, %68, %cst_26 [1] : vector<8x128xf32> to vector<8xf32>
    %70 = vector.shape_cast %69 : vector<8xf32> to vector<8x1xf32>
    %71 = vector.extract_strided_slice %7 {offsets = [0, 0], sizes = [1, 1], strides = [1, 1]} : vector<1x128xf32> to vector<1x1xf32>
    %72 = vector.broadcast %71 : vector<1x1xf32> to vector<8x1xf32>
    %73 = arith.addf %70, %72 : vector<8x1xf32>
    %cst_27 = arith.constant 0.000000e+00 : f32
    %74 = vector.broadcast %cst_27 : f32 to vector<8x1xf32>
    %75 = arith.subf %74, %73 : vector<8x1xf32>
    %76 = math.exp %75 : vector<8x1xf32>
    %cst_28 = arith.constant 1.000000e+00 : f32
    %77 = vector.broadcast %cst_28 : f32 to vector<8x1xf32>
    %78 = arith.addf %77, %76 : vector<8x1xf32>
    %79 = tpu.reciprocal %78 {approx = true} : vector<8x1xf32> -> vector<8x1xf32>
    %80 = tpu.iota {dimensions = array<i32: 1>} : vector<1x128xi32>
    %c2_i32 = arith.constant 2 : i32
    %81 = vector.broadcast %c2_i32 : i32 to vector<1x128xi32>
    %82 = arith.cmpi eq, %80, %81 : vector<1x128xi32>
    %83 = vector.shape_cast %82 : vector<1x128xi1> to vector<1x128xi1>
    %84 = vector.broadcast %83 : vector<1x128xi1> to vector<8x128xi1>
    %85 = vector.shape_cast %79 : vector<8x1xf32> to vector<8x1xf32>
    %86 = vector.broadcast %85 : vector<8x1xf32> to vector<8x128xf32>
    %87 = arith.select %84, %86, %39 : vector<8x128xi1>, vector<8x128xf32>
    %c0_29 = arith.constant 0 : index
    %c0_30 = arith.constant 0 : index
    %88 = vector.load %arg8[%c0_29, %c0_30] : memref<8x128xf32, #tpu.memory_space<vmem>>, vector<8x128xf32>
    tpu.vector_store %arg8[%c0_29, %c0_30], %87 {strides = array<i32>} : memref<8x128xf32, #tpu.memory_space<vmem>>, vector<8x128xf32>,
    return
  }
  func.func @transform_0(%arg0: i32) -> (i32, i32) {
    %c0_i32 = arith.constant 0 : i32
    %c0_i32_0 = arith.constant 0 : i32
    return %arg0, %c0_i32 : i32, i32
  }
  func.func @transform_1(%arg0: i32) -> (i32, i32) {
    %c0_i32 = arith.constant 0 : i32
    %c0_i32_0 = arith.constant 0 : i32
    %c0_i32_1 = arith.constant 0 : i32
    return %c0_i32, %c0_i32_0 : i32, i32
  }
  func.func @transform_2(%arg0: i32) -> (i32, i32) {
    %c0_i32 = arith.constant 0 : i32
    %c0_i32_0 = arith.constant 0 : i32
    %c0_i32_1 = arith.constant 0 : i32
    return %c0_i32, %c0_i32_0 : i32, i32
  }
  func.func @transform_3(%arg0: i32) -> (i32, i32) {
    %c0_i32 = arith.constant 0 : i32
    %c0_i32_0 = arith.constant 0 : i32
    %c0_i32_1 = arith.constant 0 : i32
    return %c0_i32, %c0_i32_0 : i32, i32
  }
  func.func @transform_4(%arg0: i32) -> (i32, i32) {
    %c0_i32 = arith.constant 0 : i32
    %c0_i32_0 = arith.constant 0 : i32
    %c0_i32_1 = arith.constant 0 : i32
    return %c0_i32, %c0_i32_0 : i32, i32
  }
  func.func @transform_5(%arg0: i32) -> (i32, i32) {
    %c0_i32 = arith.constant 0 : i32
    %c0_i32_0 = arith.constant 0 : i32
    %c0_i32_1 = arith.constant 0 : i32
    return %c0_i32, %c0_i32_0 : i32, i32
  }
  func.func @transform_6(%arg0: i32) -> (i32, i32) {
    %c0_i32 = arith.constant 0 : i32
    %c0_i32_0 = arith.constant 0 : i32
    %c0_i32_1 = arith.constant 0 : i32
    return %c0_i32, %c0_i32_0 : i32, i32
  }
  func.func @transform_7(%arg0: i32) -> (i32, i32) {
    %c0_i32 = arith.constant 0 : i32
    %c0_i32_0 = arith.constant 0 : i32
    return %arg0, %c0_i32 : i32, i32
  }
}

</mosaic_0001>

<bundles_post_ra>
// kernel: tpu_custom_call.1
= control target key start
LH: loop header
LB: loop body
LE: loop exit
PB: predicated region body
PF: predicated region fallthrough
CT: control target
= control target key end

     0   :  { %12 = vsyncpa [#allocation3], 0  ;;  %s652_s0 = inlined_call_operand.hbm [shape: f32[8,8], index: 0, kind: input, shape index: {}]   ;;  %s653_s1 = inlined_call_operand.hbm [shape: f32[8,128], index: 1, kind: input, shape index: {}]   ;;  %s654_s2 = inlined_call_operand.hbm [shape: f32[128,128], index: 2, kind: input, shape index: {}]   ;;  %s655_s3 = inlined_call_operand.hbm [shape: f32[128,128], index: 3, kind: input, shape index: {}]   ;;  %s656_s4 = inlined_call_operand.hbm [shape: f32[8,128], index: 4, kind: input, shape index: {}]   ;;  %s657_s5 = inlined_call_operand.hbm [shape: f32[128,128], index: 5, kind: input, shape index: {}]   ;;  %s658_s6 = inlined_call_operand.hbm [shape: f32[8,128], index: 6, kind: input, shape index: {}]   ;;  %s659_s7 = inlined_call_operand.hbm [shape: f32[8,128], index: 7, kind: output, shape index: {}]  }
   0x1   :  { %13 = vsyncpa [#allocation6], 0 }
   0x2   :  { %14 = vsyncpa [#allocation9], 0 }
   0x3   :  { %15 = vsyncpa [#allocation12], 0  ;;  %s33_s26 = sshll.u32 %s653_s1, 4  ;;  %s34_s26 = int_to_ptr.hbm [resolvable:$true] %s33_s26 }
   0x4   :  { %16 = vsyncpa [#allocation4], 0  ;;  %s560_s27 = smov [#allocation5]   ;;  %s56_s8 = sshll.u32 %s655_s3, 4  ;;  %s57_s8 = int_to_ptr.hbm [resolvable:$true] %s56_s8 }
   0x5   :  { %s35_s28 = sshll.u32 %s560_s27, 4  ;;  %s561_s9 = smov [#allocation8]   ;;  %s36_s28 = int_to_ptr.vmem [resolvable:$true] %s35_s28 }
   0x6   :  { %38 = dma.hbm_to_vmem [thread:$0]  %s34_s26, 128, %s36_s28, [#allocation6]  }
   0x7   :  { %s58_s10 = sshll.u32 %s561_s9, 4  ;;  %s80_s13 = sshll.u32 %s657_s5, 4  ;;  %s59_s10 = int_to_ptr.vmem [resolvable:$true] %s58_s10  ;;  %s81_s13 = int_to_ptr.hbm [resolvable:$true] %s80_s13 }
   0x8   :  { %s562_s1 = smov 128   ;;  %s563_s14 = smov 8  }
   0x9   :  { %64 = dma.hbm_to_vmem [thread:$0]  %s57_s8, 2048, %s59_s10, [#allocation9], %s562_s1, %s562_s1, %s563_s14  }
   0xa   :  { %s22_s17 = sshll.u32 %s652_s0, 4  ;;  %s564_s18 = smov [#allocation11]   ;;  %s23_s17 = int_to_ptr.hbm [resolvable:$true] %s22_s17 }
   0xb   :  { %s82_s19 = sshll.u32 %s564_s18, 4  ;;  %s565_s3 = smov [#allocation2]   ;;  %s83_s19 = int_to_ptr.vmem [resolvable:$true] %s82_s19 }
   0xc   :  { %88 = dma.hbm_to_vmem [thread:$0]  %s81_s13, 2048, %s83_s19, [#allocation12], %s562_s1, %s562_s1, %s563_s14  }
   0xd   :  { %s24_s20 = sshll.u32 %s565_s3, 4  ;;  %s43_s5 = sshll.u32 %s654_s2, 4  ;;  %s25_s20 = int_to_ptr.vmem [resolvable:$true] %s24_s20  ;;  %s44_s5 = int_to_ptr.hbm [resolvable:$true] %s43_s5 }
   0xe   :  { %27 = dma.hbm_to_vmem [thread:$0]  %s23_s17, 128, %s25_s20, [#allocation3]  }
   0xf   :  { %s70_s25 = sshll.u32 %s656_s4, 4  ;;  %s566_s26 = smov [#allocation7]   ;;  %s71_s25 = int_to_ptr.hbm [resolvable:$true] %s70_s25 }
  0x10   :  { %s45_s0 = sshll.u32 %s566_s26, 4  ;;  %s567_s27 = smov [#allocation10]   ;;  %s46_s0 = int_to_ptr.vmem [resolvable:$true] %s45_s0 }
  0x11   :  { %51 = dma.hbm_to_vmem [thread:$0]  %s44_s5, 2048, %s46_s0, [#allocation6], %s562_s1, %s562_s1, %s563_s14  }
  0x12   :  { %s72_s28 = sshll.u32 %s567_s27, 4  ;;  %s94_s8 = sshll.u32 %s658_s6, 4  ;;  %s73_s28 = int_to_ptr.vmem [resolvable:$true] %s72_s28  ;;  %s95_s8 = int_to_ptr.hbm [resolvable:$true] %s94_s8 }
  0x13   :  { %75 = dma.hbm_to_vmem [thread:$0]  %s71_s25, 128, %s73_s28, [#allocation9]  }
  0x14   :  { %s568_s2 = smov [#allocation13]  }
  0x15   :  { %s96_s9 = sshll.u32 %s568_s2, 4  ;;  %s97_s9 = int_to_ptr.vmem [resolvable:$true] %s96_s9 }
  0x16   :  { %99 = dma.hbm_to_vmem [thread:$0]  %s95_s8, 128, %s97_s9, [#allocation12]  }
  0x17   :  { %550 = dma.done.wait [#allocation3], 128  }
  0x18   :  { %551 = vsyncadd [#allocation3], 4294967168 }
  0x19   :  { %552 = dma.done.wait [#allocation6], 2176  }
  0x1a   :  { %553 = vsyncadd [#allocation6], 4294965120 }
  0x1b   :  { %554 = dma.done.wait [#allocation9], 2176  }
  0x1c   :  { %555 = vsyncadd [#allocation9], 4294965120 }
  0x1d   :  { %556 = dma.done.wait [#allocation12], 2176  }
  0x1e   :  { %557 = vsyncadd [#allocation12], 4294965120  ;;  %v569_v0 = vmov 0   ;;  %v128_v1 = vld [vmem:[#allocation2] sm:$0xff]  ;;  %v166_v2 = vld [vmem:[#allocation7 + $0x78] sm:$0xff]  ;;  %v570_v8 = vmov 1  }
  0x1f   :  { %344 = vset.pattern.permute.xlu0 %v569_v0  ;;  %346 = vset.pattern.permute.xlu1 %v569_v0  ;;  %v165_v3 = vld [vmem:[#allocation7 + $0x70] sm:$0xff]  ;;  %v164_v4 = vld [vmem:[#allocation7 + $0x68] sm:$0xff]  ;;  %v163_v5 = vld [vmem:[#allocation7 + $0x60] sm:$0xff]  ;;  %s571_s4 = smov [#allocation14]   ;;  %s319_s12 = sshll.u32 %s659_s7, 4  ;;  %s320_s12 = int_to_ptr.hbm [resolvable:$true] %s319_s12 }
  0x20   :  { %348 = vset.pattern.permute.xlu2 %v569_v0  ;;  %133 = vperm.xlu0 %344, %v128_v1   ;;  %v162_v6 = vld [vmem:[#allocation7 + $0x58] sm:$0xff]  ;;  %v161_v7 = vld [vmem:[#allocation7 + $0x50] sm:$0xff]  ;;  %v160_v9 = vld [vmem:[#allocation7 + $0x48] sm:$0xff]  ;;  %s317_s6 = sshll.u32 %s571_s4, 4  ;;  %s318_s6 = int_to_ptr.vmem [resolvable:$true] %s317_s6 }
  0x21   :  { %168 = vmatpush.msra.mxu0 %v166_v2  ;;  %v159_v10 = vld [vmem:[#allocation7 + $0x40] sm:$0xff]  ;;  %v158_v11 = vld [vmem:[#allocation7 + $0x38] sm:$0xff]  ;;  %v157_v12 = vld [vmem:[#allocation7 + $0x30] sm:$0xff] }
  0x22   :  { %v156_v13 = vld [vmem:[#allocation7 + $0x28] sm:$0xff]  ;;  %v155_v14 = vld [vmem:[#allocation7 + $0x20] sm:$0xff]  ;;  %v154_v15 = vld [vmem:[#allocation7 + $0x18] sm:$0xff] }
  0x23   :  { %169 = vmatpush.msra.mxu0 %v165_v3  ;;  %v153_v16 = vld [vmem:[#allocation7 + $0x10] sm:$0xff]  ;;  %v152_v17 = vld [vmem:[#allocation7 + $0x8] sm:$0xff]  ;;  %v151_v18 = vld [vmem:[#allocation7] sm:$0xff] }
  0x24   :  { %v206_v19 = vld [vmem:[#allocation8 + $0x78] sm:$0xff]  ;;  %v205_v20 = vld [vmem:[#allocation8 + $0x70] sm:$0xff]  ;;  %v204_v21 = vld [vmem:[#allocation8 + $0x68] sm:$0xff] }
  0x25   :  { %170 = vmatpush.msra.mxu0 %v164_v4  ;;  %208 = vmatpush.msra.mxu1 %v206_v19  ;;  %v203_v22 = vld [vmem:[#allocation8 + $0x60] sm:$0xff]  ;;  %v202_v23 = vld [vmem:[#allocation8 + $0x58] sm:$0xff]  ;;  %v201_v24 = vld [vmem:[#allocation8 + $0x50] sm:$0xff] }
  0x26   :  { %v200_v25 = vld [vmem:[#allocation8 + $0x48] sm:$0xff]  ;;  %v199_v26 = vld [vmem:[#allocation8 + $0x40] sm:$0xff]  ;;  %v198_v28 = vld [vmem:[#allocation8 + $0x38] sm:$0xff] }
  0x27   :  { %171 = vmatpush.msra.mxu0 %v163_v5  ;;  %209 = vmatpush.msra.mxu1 %v205_v20  ;;  %v197_v29 = vld [vmem:[#allocation8 + $0x30] sm:$0xff]  ;;  %v196_v30 = vld [vmem:[#allocation8 + $0x28] sm:$0xff]  ;;  %v350_v31 = vld [vmem:[#allocation5] ss:$0 sm:$0xff] }
  0x28   :  { %345 = vset.pattern.permute.xlu0 %v570_v8  ;;  %v351_v32 = vld [vmem:[#allocation5 + $0x1] ss:$0 sm:$0xff]  ;;  %v634_v33 = vld [vmem:[#allocation13] sm:$0xff]  ;;  %v195_v34 = vld [vmem:[#allocation8 + $0x20] sm:$0xff] }
  0x29   :  { %172 = vmatpush.msra.mxu0 %v162_v6  ;;  %140 = vperm.xlu0 %345, %v128_v1   ;;  %v194_v36 = vld [vmem:[#allocation8 + $0x18] sm:$0xff]  ;;  %v146_v38 = vperm.slane %v634_v33, 0  ;;  %v193_v44 = vld [vmem:[#allocation8 + $0x10] sm:$0xff]  ;;  %v192_v45 = vld [vmem:[#allocation8 + $0x8] sm:$0xff]  ;;  %v167_v47 = vperm.slane %v634_v33, 1  ;;  %v207_v59 = vperm.slane %v634_v33, 2 }
  0x2a   :  { %210 = vmatpush.msra.mxu1 %v204_v21  ;;  %v191_v46 = vld [vmem:[#allocation8] sm:$0xff]  ;;  %v263_v53 = vld [vmem:[#allocation11 + $0x70] sm:$0xff]  ;;  %v262_v54 = vld [vmem:[#allocation11 + $0x68] sm:$0xff]  ;;  %v289_v21 = vperm.slane %v634_v33, 6 }
  0x2b   :  { %173 = vmatpush.msra.mxu0 %v161_v7  ;;  %v264_v52 = vld [vmem:[#allocation11 + $0x78] sm:$0xff]  ;;  %v261_v55 = vld [vmem:[#allocation11 + $0x60] sm:$0xff]  ;;  %v259_v57 = vld [vmem:[#allocation11 + $0x50] sm:$0xff] }
  0x2c   :  { %211 = vmatpush.msra.mxu1 %v203_v22  ;;  %266 = vmatpush.msra.mxu2 %v264_v52  ;;  %v260_v56 = vld [vmem:[#allocation11 + $0x58] sm:$0xff]  ;;  %v258_v58 = vld [vmem:[#allocation11 + $0x48] sm:$0xff]  ;;  %v257_v62 = vld [vmem:[#allocation11 + $0x40] sm:$0xff] }
  0x2d   :  { %174 = vmatpush.msra.mxu0 %v160_v9  ;;  %v256_v63 = vld [vmem:[#allocation11 + $0x38] sm:$0xff]  ;;  %v254_v1 = vld [vmem:[#allocation11 + $0x28] sm:$0xff]  ;;  %v253_v2 = vld [vmem:[#allocation11 + $0x20] sm:$0xff] }
  0x2e   :  { %212 = vmatpush.msra.mxu1 %v202_v23  ;;  %267 = vmatpush.msra.mxu2 %v263_v53  ;;  %v252_v3 = vld [vmem:[#allocation11 + $0x18] sm:$0xff]  ;;  %v251_v4 = vld [vmem:[#allocation11 + $0x10] sm:$0xff]  ;;  %v250_v5 = vld [vmem:[#allocation11 + $0x8] sm:$0xff] }
  0x2f   :  { %175 = vmatpush.msra.mxu0 %v159_v10  ;;  %v249_v6 = vld [vmem:[#allocation11] sm:$0xff]  ;;  %v353_v9 = vld [vmem:[#allocation10 + $0x1] ss:$0 sm:$0xff] }
  0x30   :  { %213 = vmatpush.msra.mxu1 %v201_v24  ;;  %268 = vmatpush.msra.mxu2 %v262_v54 }
  0x31   :  { %349 = vset.pattern.permute.xlu0 %v569_v0  ;;  %176 = vmatpush.msra.mxu0 %v158_v11  ;;  %v255_v0 = vld [vmem:[#allocation11 + $0x30] sm:$0xff] }
  0x32   :  { %214 = vmatpush.msra.mxu1 %v200_v25  ;;  %269 = vmatpush.msra.mxu2 %v261_v55  ;;  %v293_v25 = vperm.slane %v634_v33, 5 }
  0x33   :  { %177 = vmatpush.msra.mxu0 %v157_v12  ;;  %v244_v12 = vperm.slane %v634_v33, 3 }
  0x34   :  { %215 = vmatpush.msra.mxu1 %v199_v26  ;;  %270 = vmatpush.msra.mxu2 %v260_v56 }
  0x35   :  { %178 = vmatpush.msra.mxu0 %v156_v13 }
  0x36   :  { %216 = vmatpush.msra.mxu1 %v198_v28  ;;  %271 = vmatpush.msra.mxu2 %v259_v57 }
  0x37   :  { %179 = vmatpush.msra.mxu0 %v155_v14 }
  0x38   :  { %217 = vmatpush.msra.mxu1 %v197_v29  ;;  %272 = vmatpush.msra.mxu2 %v258_v58 }
  0x39   :  { %180 = vmatpush.msra.mxu0 %v154_v15 }
  0x3a   :  { %218 = vmatpush.msra.mxu1 %v196_v30  ;;  %273 = vmatpush.msra.mxu2 %v257_v62 }
  0x3b   :  { %181 = vmatpush.msra.mxu0 %v153_v16 }
  0x3c   :  { %219 = vmatpush.msra.mxu1 %v195_v34  ;;  %274 = vmatpush.msra.mxu2 %v256_v63  ;;  %v300_v34 = vlaneseq }
  0x3d   :  { %182 = vmatpush.msra.mxu0 %v152_v17 }
  0x3e   :  { %220 = vmatpush.msra.mxu1 %v194_v36  ;;  %275 = vmatpush.msra.mxu2 %v255_v0 }
  0x3f   :  { %183 = vmatpush.msra.mxu0 %v151_v18  ;;  %v265_v18 = vperm.slane %v634_v33, 4 }
  0x40   :  { %221 = vmatpush.msra.mxu1 %v193_v44  ;;  %276 = vmatpush.msra.mxu2 %v254_v1 }
  0x42   :  { %222 = vmatpush.msra.mxu1 %v192_v45  ;;  %277 = vmatpush.msra.mxu2 %v253_v2 }
  0x44   :  { %223 = vmatpush.msra.mxu1 %v191_v46  ;;  %278 = vmatpush.msra.mxu2 %v252_v3 }
  0x46   :  { %279 = vmatpush.msra.mxu2 %v251_v4 }
  0x48   :  { %280 = vmatpush.msra.mxu2 %v250_v5 }
  0x4a   :  { %281 = vmatpush.msra.mxu2 %v249_v6 }
  0x92   :  { %v134_v27 = vpop.permute.xlu0 %133 }
  0x93   :  { %v137_v37 = vmul.f32 %v350_v31, %v134_v27 }
  0x9b   :  { %v141_v35 = vpop.permute.xlu0 %140 }
  0x9c   :  { %v144_v39 = vmul.f32 %v351_v32, %v141_v35  ;;  %v301_v35 = vand.u32 127, %v300_v34 }
  0x9e   :  { %v145_v40 = vadd.f32 %v144_v39, %v137_v37  ;;  %vm302_vm4 = vcmp.eq.s32.totalorder %v301_v35, 2 }
  0xa0   :  { %v147_v41 = vadd.f32 %v146_v38, %v145_v40 }
  0xa2   :  { %vm148_vm0 = vcmp.ge.f32.partialorder %v147_v41, 0.0  ;;  %v149_v42 = vmul.f32 0.01, %v147_v41 }
  0xa4   :  { %v150_v43 = vsel %vm148_vm0, %v147_v41, %v149_v42 }
  0xa5   :  { %184 = vmatmul.f32.vlgmr.msra.gmra.mxu0 %v150_v43 }
 0x122   :  { %v185_v48 = vpop.f32.mrf.mxu0 }
 0x123   :  { %v186_v49 = vadd.f32 %v185_v48, %v167_v47 }
 0x125   :  { %vm188_vm1 = vcmp.ge.f32.partialorder %v186_v49, 0.0  ;;  %v189_v50 = vmul.f32 0.01, %v186_v49 }
 0x127   :  { %v190_v51 = vsel %vm188_vm1, %v186_v49, %v189_v50 }
 0x128   :  { %224 = vmatmul.f32.vlgmr.msra.gmra.mxu1 %v190_v51 }
 0x1a5   :  { %v225_v60 = vpop.f32.mrf.mxu1 }
 0x1a6   :  { %v639_v61 = vadd.f32 %v225_v60, %v207_v59 }
 0x1a8   :  { %231 = vperm.xlu1 %346, %v639_v61  }
 0x1b0   :  { %347 = vset.pattern.permute.xlu1 %v570_v8  ;;  %v352_v8 = vld [vmem:[#allocation10] ss:$0 sm:$0xff] }
 0x1b1   :  { %238 = vperm.xlu1 %347, %v639_v61  }
 0x21a   :  { %v232_v7 = vpop.permute.xlu1 %231 }
 0x21b   :  { %v235_v11 = vmul.f32 %v352_v8, %v232_v7 }
 0x223   :  { %v239_v10 = vpop.permute.xlu1 %238 }
 0x224   :  { %v242_v13 = vmul.f32 %v353_v9, %v239_v10 }
 0x226   :  { %v243_v14 = vadd.f32 %v242_v13, %v235_v11 }
 0x228   :  { %v245_v15 = vadd.f32 %v244_v12, %v243_v14 }
 0x22a   :  { %vm246_vm2 = vcmp.ge.f32.partialorder %v245_v15, 0.0  ;;  %v247_v16 = vmul.f32 0.01, %v245_v15 }
 0x22c   :  { %v248_v17 = vsel %vm246_vm2, %v245_v15, %v247_v16 }
 0x22d   :  { %282 = vmatmul.f32.vlgmr.msra.gmra.mxu2 %v248_v17 }
 0x2b0   :  { %v283_v19 = vpop.f32.mrf.mxu2 }
 0x2b1   :  { %v284_v20 = vadd.f32 %v283_v19, %v265_v18 }
 0x2b3   :  { %v287_v22 = vmul.f32 0.01, %v284_v20  ;;  %vm286_vm3 = vcmp.ge.f32.partialorder %v284_v20, 0.0 }
 0x2b5   :  { %v288_v23 = vsel %vm286_vm3, %v284_v20, %v287_v22 }
 0x2b6   :  { %v290_v24 = vmul.f32 %v289_v21, %v288_v23 }
 0x2b8   :  { %291 = vadd.xlane.f32.xlu2 %v290_v24 }
 0x32b   :  { %v292_v26 = vpop.xlane.xlu2 %291 }
 0x32c   :  { %v294_v27 = vadd.f32 %v293_v25, %v292_v26 }
 0x32e   :  { %v295_v28 = vsub.f32 0.0, %v294_v27 }
 0x330   :  { %v296_v29 = vmul.f32 1.442695, %v295_v28 }
 0x332   :  { %354 = vpow2.f32 %v296_v29 }
 0x338   :  { %v355_v30 = vpop.eup %354 }
 0x339   :  { %v298_v31 = vadd.f32 1.0, %v355_v30 }
 0x33b   :  { %356 = vrcp.f32 %v298_v31 }
 0x341   :  { %v357_v32 = vpop.eup %356 }
 0x342   :  { %307 = vperm.xlu2 %348, %v357_v32  }
 0x39c   :  { %v308_v33 = vpop.permute.xlu2 %307 }
 0x39d   :  { %v310_v36 = vsel %vm302_vm4, %v308_v33, %v639_v61 }
 0x39e   :  { %311 = vst [vmem:[#allocation14] sm:$0xff] %v310_v36 }
 0x39f   :  { %322 = dma.vmem_to_hbm [thread:$0]  %s318_s6, 128, %s320_s12, [#allocation4]  }
 0x3a0   :  { %558 = dma.done.wait [#allocation4], 128  }
 0x3a1   :  { %559 = vsyncadd [#allocation4], 4294967168 }
 0x3a2   :  { %327 = vsyncpa [#allocation3], 1 }
 0x3a3   :  { %328 = vsyncpa [#allocation6], 1 }
 0x3a4   :  { %329 = vsyncpa [#allocation9], 1 }
 0x3a5   :  { %330 = vsyncpa [#allocation12], 1 }
 0x3a6   :  { %331 = vsyncpa [#allocation4], 1 }

</bundles_post_ra>
